<compile_context>
chip_gen: v5e
topology: v5e:2x2
jax: 0.10.0
libtpu: 0.0.40
codegen_flags: <defaults>
</compile_context>

<pallas_src>
import jax
import jax.numpy as jnp
from jax.experimental import pallas as pl
from jax.experimental.pallas import tpu as pltpu

HIDDEN = 100       # logical hidden width (matches the PyTorch module)
HIDDEN_PAD = 128   # padded hidden width (full lane width, unmasked vector ops)


def _round_up(x, m):
    return ((x + m - 1) // m) * m


def critic_kernel(xt_ref, w1t_ref, w2_ref, b2_ref, q_ref):
    # xt : (D+1, bm)   augmented, transposed input block ([s | a | 1]^T)
    # w1t: (128, D+1)  [W1^T | b1] (hidden padded 100->128 with zero rows)
    # w2 : (1, 128)    W2 row (padded entries are zero)
    # b2 : (1, 1)      scalar bias in SMEM
    # q  : (1, bm)     lane-dense output block (batch in the lane dimension)
    h_t = jnp.tanh(
        jnp.dot(w1t_ref[...], xt_ref[...], preferred_element_type=jnp.float32)
    )  # (128, bm), f32 — bias already folded in via the ones-row of xt

    q_row = jnp.dot(w2_ref[...], h_t, preferred_element_type=jnp.float32)  # (1, bm)
    q_ref[...] = (q_row + b2_ref[0, 0]).astype(q_ref.dtype)


def critic_forward(s, a, params, *, block_b=4096):
    """Q(s, a). Returns (B, 1), matching the PyTorch module."""
    w1t_aug, w2_row, b2 = params
    # Keep f32 (exact vs. reference; v5e has no bf16 VPU/EUP). bf16 callers may
    # pass bf16 activations/weights; the MXU still accumulates in f32.
    s = s.astype(jnp.float32)
    a = a.astype(jnp.float32)
    B = s.shape[0]
    d_aug = w1t_aug.shape[1]  # state_dim + action_dim + 1

    # Batch tiling: lane-aligned tile, hard-capped for v7x VMEM; pad B up to a
    # multiple of the tile instead of collapsing to a single giant block.
    block_b = _round_up(min(block_b, 8192), 128)
    bb = min(block_b, _round_up(B, 128))
    Bp = _round_up(B, bb)
    grid = (Bp // bb,)

    # One fused concat(+pad)+transpose in the wrapper -> contiguous (D+1, Bp)
    # LHS-transposed input; padded batch rows are all-zero (sliced off below).
    x = jnp.concatenate([s, a, jnp.ones((B, 1), jnp.float32)], axis=1)  # (B, D+1)
    if Bp != B:
        x = jnp.pad(x, ((0, Bp - B), (0, 0)))
    xt = x.T  # (D+1, Bp)

    q_row = pl.pallas_call(
        critic_kernel,
        out_shape=jax.ShapeDtypeStruct((1, Bp), jnp.float32),
        grid=grid,
        in_specs=[
            pl.BlockSpec((d_aug, bb), lambda i: (0, i)),            # x_aug^T
            pl.BlockSpec((HIDDEN_PAD, d_aug), lambda i: (0, 0)),    # W1_aug (resident)
            pl.BlockSpec((1, HIDDEN_PAD), lambda i: (0, 0)),        # W2 row (resident)
            pl.BlockSpec(memory_space=pltpu.MemorySpace.SMEM),      # b2 scalar
        ],
        out_specs=pl.BlockSpec((1, bb), lambda i: (0, i)),
        compiler_params=pltpu.CompilerParams(
            dimension_semantics=("parallel",)),
    )(xt, w1t_aug, w2_row, b2)

    return q_row[0, :B].reshape(B, 1)


def init_critic_params(key, state_dim, action_dim):
    """PyTorch-style init (U(-1/sqrt(fan_in), +)), then pad/fold for the kernel."""
    d = state_dim + action_dim
    k1, k2, k3, k4 = jax.random.split(key, 4)
    bound1 = 1.0 / jnp.sqrt(jnp.float32(d))
    bound2 = 1.0 / jnp.sqrt(jnp.float32(HIDDEN))
    w1 = jax.random.uniform(k1, (d, HIDDEN), jnp.float32, -bound1, bound1)
    b1 = jax.random.uniform(k2, (HIDDEN,), jnp.float32, -bound1, bound1)
    w2 = jax.random.uniform(k3, (HIDDEN, 1), jnp.float32, -bound2, bound2)
    b2 = jax.random.uniform(k4, (1, 1), jnp.float32, -bound2, bound2)

    # Pad hidden 100 -> 128 with zeros. Zero W2 entries for the padded lanes
    # guarantee they contribute nothing, so the math is exactly the original.
    pad = HIDDEN_PAD - HIDDEN
    w1p = jnp.pad(w1, ((0, 0), (0, pad)))          # (d, 128)
    b1p = jnp.pad(b1, ((0, pad)))                  # (128,)
    w2_row = jnp.pad(w2.T, ((0, 0), (0, pad)))     # (1, 128)

    # Transposed, bias-augmented layer-1 weight:
    #   h^T = tanh( W1_aug @ [x | 1]^T ),  W1_aug = [W1^T | b1] : (128, d+1)
    w1t_aug = jnp.concatenate([w1p.T, b1p[:, None]], axis=1)  # (128, d+1)
    return (w1t_aug, w2_row, b2)


def critic_reference(s, a, params):
    """Pure-JAX reference (identical math to the PyTorch module)."""
    w1t_aug, w2_row, b2 = params
    w1t = w1t_aug[:, :-1]   # (128, d)
    b1 = w1t_aug[:, -1]     # (128,)
    x = jnp.concatenate([s, a], axis=1).astype(jnp.float32)
    h = jnp.tanh(jnp.dot(x, w1t.T, precision=jax.lax.Precision.HIGHEST) + b1)
    return jnp.dot(h, w2_row.T, precision=jax.lax.Precision.HIGHEST) + b2


if __name__ == "__main__":
    key = jax.random.PRNGKey(0)
    k_params, k_s, k_a = jax.random.split(key, 3)

    batch, state_dim, action_dim = 2, 8, 4
    params = init_critic_params(k_params, state_dim, action_dim)

    s = jax.random.normal(k_s, (batch, state_dim), jnp.float32)
    a = jax.random.normal(k_a, (batch, action_dim), jnp.float32)

    q = critic_forward(s, a, params)
    jax.block_until_ready(q)

    q_ref = critic_reference(s, a, params)
    assert q.shape == (batch, 1), q.shape
    assert jnp.allclose(q, q_ref, atol=1e-5, rtol=1e-5), (q, q_ref)

    print("KERNEL_OK")
</pallas_src>

<mosaic_0001>
module attributes {stable_mosaic.version = 11 : i64} {
  func.func @critic_kernel(%arg0: i32, %arg1: memref<13x128xf32, #tpu.memory_space<vmem>>, %arg2: memref<128x13xf32, #tpu.memory_space<vmem>>, %arg3: memref<1x128xf32, #tpu.memory_space<vmem>>, %arg4: memref<1x1xf32, #tpu.memory_space<smem>>, %arg5: memref<1x128xf32, #tpu.memory_space<vmem>>) attributes {dimension_semantics = [#tpu.dimension_semantics<parallel>], iteration_bounds = array<i64: 1>, scalar_prefetch = 0 : i64, scratch_operands = 0 : i64, tpu.core_type = #tpu.core_type<tc>, window_params = [{transform_indices = @transform_0, window_bounds = array<i64: 13, 128>}, {pipeline_mode = #tpu.pipeline_mode<synchronous>, transform_indices = @transform_1, window_bounds = array<i64: 128, 13>}, {pipeline_mode = #tpu.pipeline_mode<synchronous>, transform_indices = @transform_2, window_bounds = array<i64: 1, 128>}, {transform_indices = @transform_3, window_bounds = array<i64: 1, 1>}, {transform_indices = @transform_4, window_bounds = array<i64: 1, 128>}]} {
    %c0 = arith.constant 0 : index
    %c0_0 = arith.constant 0 : index
    %0 = vector.load %arg2[%c0, %c0_0] : memref<128x13xf32, #tpu.memory_space<vmem>>, vector<128x13xf32>
    %c0_1 = arith.constant 0 : index
    %c0_2 = arith.constant 0 : index
    %1 = vector.load %arg1[%c0_1, %c0_2] : memref<13x128xf32, #tpu.memory_space<vmem>>, vector<13x128xf32>
    %cst = arith.constant dense<0.000000e+00> : vector<128x128xf32>
    %2 = tpu.matmul %0, %1, %cst {dimension_numbers = #tpu.dot_dimension_numbers<[1], [0], [0], [1], [0, 0, 1, 1], [], []>} : vector<128x13xf32>, vector<13x128xf32>, vector<128x128xf32> -> vector<128x128xf32>
    %3 = math.tanh %2 : vector<128x128xf32>
    %c0_3 = arith.constant 0 : index
    %c0_4 = arith.constant 0 : index
    %4 = vector.load %arg3[%c0_3, %c0_4] : memref<1x128xf32, #tpu.memory_space<vmem>>, vector<1x128xf32>
    %cst_5 = arith.constant dense<0.000000e+00> : vector<1x128xf32>
    %5 = tpu.matmul %4, %3, %cst_5 {dimension_numbers = #tpu.dot_dimension_numbers<[1], [0], [0], [1], [0, 0, 1, 1], [], []>} : vector<1x128xf32>, vector<128x128xf32>, vector<1x128xf32> -> vector<1x128xf32>
    %c0_6 = arith.constant 0 : index
    %c0_7 = arith.constant 0 : index
    %6 = memref.load %arg4[%c0_6, %c0_7] : memref<1x1xf32, #tpu.memory_space<smem>>
    %7 = vector.broadcast %6 : f32 to vector<1x128xf32>
    %8 = arith.addf %5, %7 : vector<1x128xf32>
    %c0_8 = arith.constant 0 : index
    %c0_9 = arith.constant 0 : index
    %9 = vector.load %arg5[%c0_8, %c0_9] : memref<1x128xf32, #tpu.memory_space<vmem>>, vector<1x128xf32>
    tpu.vector_store %arg5[%c0_8, %c0_9], %8 {strides = array<i32>} : memref<1x128xf32, #tpu.memory_space<vmem>>, vector<1x128xf32>,
    return
  }
  func.func @transform_0(%arg0: i32) -> (i32, i32) {
    %c0_i32 = arith.constant 0 : i32
    %c0_i32_0 = arith.constant 0 : i32
    return %c0_i32, %arg0 : i32, i32
  }
  func.func @transform_1(%arg0: i32) -> (i32, i32) {
    %c0_i32 = arith.constant 0 : i32
    %c0_i32_0 = arith.constant 0 : i32
    %c0_i32_1 = arith.constant 0 : i32
    return %c0_i32, %c0_i32_0 : i32, i32
  }
  func.func @transform_2(%arg0: i32) -> (i32, i32) {
    %c0_i32 = arith.constant 0 : i32
    %c0_i32_0 = arith.constant 0 : i32
    %c0_i32_1 = arith.constant 0 : i32
    return %c0_i32, %c0_i32_0 : i32, i32
  }
  func.func @transform_3(%arg0: i32) -> (i32, i32) {
    %c0_i32 = arith.constant 0 : i32
    %c0_i32_0 = arith.constant 0 : i32
    %c0_i32_1 = arith.constant 0 : i32
    return %c0_i32, %c0_i32_0 : i32, i32
  }
  func.func @transform_4(%arg0: i32) -> (i32, i32) {
    %c0_i32 = arith.constant 0 : i32
    %c0_i32_0 = arith.constant 0 : i32
    return %c0_i32, %arg0 : i32, i32
  }
}

</mosaic_0001>

<bundles_post_ra>
// kernel: tpu_custom_call.1
= control target key start
LH: loop header
LB: loop body
LE: loop exit
PB: predicated region body
PF: predicated region fallthrough
CT: control target
= control target key end

     0   :  { %vm86_vm0 = vcmask 1044480   ;;  %vm37_vm1 = vcmask 105472   ;;  %s396_s0 = inlined_call_operand.vmem [shape: f32[13,128], index: 0, kind: input, shape index: {}]   ;;  %s397_s1 = inlined_call_operand.vmem [shape: f32[128,13], index: 1, kind: input, shape index: {}]   ;;  %s398_s2 = inlined_call_operand.vmem [shape: f32[1,128], index: 2, kind: input, shape index: {}]   ;;  %s399_s3 = inlined_call_operand.<no memory space> [shape: f32[1,1], index: 3, kind: input, shape index: {}]   ;;  %s400_s4 = inlined_call_operand.hbm [shape: f32[1,128], index: 4, kind: output, shape index: {}]  }
   0x1   :  { %v36_v0 = vld [vmem:[%s396_s0 + $0x8] sm:$0x1f]  ;;  %v35_v1 = vld [vmem:[%s396_s0] sm:$0xff]  ;;  %v30_v2 = vld [vmem:[%s397_s1 + $0x58] sm:$0xff] }
   0x2   :  { %229 = vmatpush.msk.msra.mxu3 %vm86_vm0, %v36_v0  ;;  %228 = vmatpush.msk.msra.mxu2 %vm86_vm0, %v36_v0  ;;  %v24_v3 = vld [vmem:[%s397_s1 + $0x28] sm:$0xff]  ;;  %v19_v4 = vld [vmem:[%s397_s1] sm:$0xff] }
   0x3   :  { %211 = vmatpush.msk.msra.mxu0 %vm86_vm0, %v36_v0 }
   0x4   :  { %231 = vmatpush.msra.mxu3 %v35_v1  ;;  %230 = vmatpush.msra.mxu2 %v35_v1 }
   0x5   :  { %223 = vmatmul.msk.f32.vlgmr.msra.gmra.mxu3 %vm37_vm1, %v30_v2  ;;  %217 = vmatmul.msk.f32.vlgmr.msra.gmra.mxu2 %vm37_vm1, %v24_v3 }
   0x6   :  { %105 = vmatpush.msra.mxu0 %v35_v1 }
   0x7   :  { %10 = vsyncpa [#allocation4], 0  ;;  %212 = vmatmul.msk.f32.vlgmr.msra.gmra.mxu0 %vm37_vm1, %v19_v4  ;;  %v31_v5 = vld [vmem:[%s397_s1 + $0x60] sm:$0xff]  ;;  %v25_v6 = vld [vmem:[%s397_s1 + $0x30] sm:$0xff]  ;;  %v173_v51 = vstv %s399_s3  ;;  %s291_s26 = smov [#allocation3]   ;;  %s202_s30 = sshll.u32 %s400_s4, 4  ;;  %s203_s30 = int_to_ptr.hbm [resolvable:$true] %s202_s30 }
   0x8   :  { %v20_v7 = vld [vmem:[%s397_s1 + $0x8] sm:$0xff]  ;;  %v26_v9 = vld [vmem:[%s397_s1 + $0x38] sm:$0xff]  ;;  %v21_v10 = vld [vmem:[%s397_s1 + $0x10] sm:$0xff]  ;;  %s200_s27 = sshll.u32 %s291_s26, 4  ;;  %s201_s27 = int_to_ptr.vmem [resolvable:$true] %s200_s27 }
   0x9   :  { %v32_v8 = vld [vmem:[%s397_s1 + $0x68] sm:$0xff]  ;;  %v33_v11 = vld [vmem:[%s397_s1 + $0x70] sm:$0xff]  ;;  %v27_v12 = vld [vmem:[%s397_s1 + $0x40] sm:$0xff] }
   0xa   :  { %v22_v13 = vld [vmem:[%s397_s1 + $0x18] sm:$0xff]  ;;  %v28_v15 = vld [vmem:[%s397_s1 + $0x48] sm:$0xff]  ;;  %v23_v16 = vld [vmem:[%s397_s1 + $0x20] sm:$0xff] }
   0xb   :  { %v34_v14 = vld [vmem:[%s397_s1 + $0x78] sm:$0xff]  ;;  %v29_v17 = vld [vmem:[%s397_s1 + $0x50] sm:$0xff]  ;;  %v171_v49 = vld [vmem:[%s398_s2] sm:$0x1] }
   0xd   :  { %224 = vmatmul.msk.f32.gmra.mxu3 %vm37_vm1, %v31_v5  ;;  %218 = vmatmul.msk.f32.gmra.mxu2 %vm37_vm1, %v25_v6 }
   0xf   :  { %213 = vmatmul.msk.f32.gmra.mxu0 %vm37_vm1, %v20_v7 }
  0x15   :  { %225 = vmatmul.msk.f32.gmra.mxu3 %vm37_vm1, %v32_v8  ;;  %219 = vmatmul.msk.f32.gmra.mxu2 %vm37_vm1, %v26_v9 }
  0x17   :  { %214 = vmatmul.msk.f32.gmra.mxu0 %vm37_vm1, %v21_v10 }
  0x1d   :  { %226 = vmatmul.msk.f32.gmra.mxu3 %vm37_vm1, %v33_v11  ;;  %220 = vmatmul.msk.f32.gmra.mxu2 %vm37_vm1, %v27_v12 }
  0x1f   :  { %215 = vmatmul.msk.f32.gmra.mxu0 %vm37_vm1, %v22_v13 }
  0x25   :  { %227 = vmatmul.msk.f32.gmra.mxu3 %vm37_vm1, %v34_v14  ;;  %221 = vmatmul.msk.f32.gmra.mxu2 %vm37_vm1, %v28_v15 }
  0x27   :  { %216 = vmatmul.msk.f32.gmra.mxu0 %vm37_vm1, %v23_v16 }
  0x2d   :  { %222 = vmatmul.msk.f32.gmra.mxu2 %vm37_vm1, %v29_v17 }
  0x84   :  { %v107_v22 = vpop.f32.mrf.mxu0 }
  0x88   :  { %v140_v18 = vpop.f32.mrf.mxu3  ;;  %v122_v19 = vpop.f32.mrf.mxu2 }
  0x8c   :  { %v110_v25 = vpop.f32.mrf.mxu0 }
  0x90   :  { %v143_v20 = vpop.f32.mrf.mxu3  ;;  %v125_v21 = vpop.f32.mrf.mxu2 }
  0x94   :  { %v113_v28 = vpop.f32.mrf.mxu0 }
  0x98   :  { %v146_v23 = vpop.f32.mrf.mxu3  ;;  %v128_v24 = vpop.f32.mrf.mxu2 }
  0x9c   :  { %v116_v33 = vpop.f32.mrf.mxu0 }
  0xa0   :  { %v149_v26 = vpop.f32.mrf.mxu3  ;;  %v131_v27 = vpop.f32.mrf.mxu2 }
  0xa4   :  { %v119_v39 = vpop.f32.mrf.mxu0 }
  0xa8   :  { %v152_v29 = vpop.f32.mrf.mxu3  ;;  %v134_v30 = vpop.f32.mrf.mxu2 }
  0xa9   :  { %233 = vtanh.f32 %v152_v29 }
  0xaa   :  { %235 = vtanh.f32 %v149_v26 }
  0xab   :  { %237 = vtanh.f32 %v146_v23 }
  0xac   :  { %239 = vtanh.f32 %v143_v20 }
  0xad   :  { %241 = vtanh.f32 %v140_v18 }
  0xaf   :  { %v234_v31 = vpop.eup %233 }
  0xb0   :  { %174 = vmatpush.msra.mxu1 %v234_v31  ;;  %v137_v32 = vpop.f32.mrf.mxu2  ;;  %v236_v34 = vpop.eup %235 }
  0xb1   :  { %243 = vtanh.f32 %v137_v32  ;;  %v238_v35 = vpop.eup %237 }
  0xb2   :  { %175 = vmatpush.msra.mxu1 %v236_v34  ;;  %v240_v36 = vpop.eup %239  ;;  %245 = vtanh.f32 %v134_v30 }
  0xb3   :  { %v242_v37 = vpop.eup %241  ;;  %247 = vtanh.f32 %v131_v27 }
  0xb4   :  { %176 = vmatpush.msra.mxu1 %v238_v35  ;;  %249 = vtanh.f32 %v128_v24 }
  0xb5   :  { %251 = vtanh.f32 %v125_v21 }
  0xb6   :  { %177 = vmatpush.msra.mxu1 %v240_v36  ;;  %253 = vtanh.f32 %v122_v19 }
  0xb7   :  { %v244_v38 = vpop.eup %243  ;;  %255 = vtanh.f32 %v119_v39 }
  0xb8   :  { %178 = vmatpush.msra.mxu1 %v242_v37  ;;  %v246_v40 = vpop.eup %245  ;;  %257 = vtanh.f32 %v116_v33 }
  0xb9   :  { %v248_v41 = vpop.eup %247  ;;  %259 = vtanh.f32 %v113_v28 }
  0xba   :  { %179 = vmatpush.msra.mxu1 %v244_v38  ;;  %v250_v42 = vpop.eup %249  ;;  %261 = vtanh.f32 %v110_v25 }
  0xbb   :  { %v252_v43 = vpop.eup %251  ;;  %263 = vtanh.f32 %v107_v22 }
  0xbc   :  { %180 = vmatpush.msra.mxu1 %v246_v40  ;;  %v254_v44 = vpop.eup %253 }
  0xbd   :  { %v256_v45 = vpop.eup %255 }
  0xbe   :  { %181 = vmatpush.msra.mxu1 %v248_v41  ;;  %v258_v46 = vpop.eup %257 }
  0xbf   :  { %v260_v47 = vpop.eup %259 }
  0xc0   :  { %182 = vmatpush.msra.mxu1 %v250_v42  ;;  %v262_v48 = vpop.eup %261 }
  0xc1   :  { %v264_v50 = vpop.eup %263 }
  0xc2   :  { %183 = vmatpush.msra.mxu1 %v252_v43 }
  0xc4   :  { %184 = vmatpush.msra.mxu1 %v254_v44 }
  0xc6   :  { %185 = vmatpush.msra.mxu1 %v256_v45 }
  0xc8   :  { %186 = vmatpush.msra.mxu1 %v258_v46 }
  0xca   :  { %187 = vmatpush.msra.mxu1 %v260_v47 }
  0xcc   :  { %188 = vmatpush.msra.mxu1 %v262_v48 }
  0xce   :  { %189 = vmatpush.msra.mxu1 %v264_v50 }
  0xcf   :  { %190 = vmatmul.f32.vlgmr.msra.gmra.mxu1 %v171_v49 }
 0x14c   :  { %v191_v52 = vpop.f32.mrf.mxu1 }
 0x14d   :  { %v192_v53 = vadd.f32 %v191_v52, %v173_v51 }
 0x14f   :  { %194 = vst [vmem:[#allocation3] sm:$0x1] %v192_v53 }
 0x150   :  { %205 = dma.vmem_to_hbm [thread:$0]  %s201_s27, 16, %s203_s30, [#allocation4]  }
 0x151   :  { %289 = dma.done.wait [#allocation4], 16  }
 0x152   :  { %290 = vsyncadd [#allocation4], 4294967280 }
 0x153   :  { %210 = vsyncpa [#allocation4], 1 }

</bundles_post_ra>
